<compile_context>
chip_gen: v7x
topology: tpu7x:2x2x1
jax: 0.10.0
libtpu: 0.0.40
codegen_flags: <defaults>
</compile_context>

<pallas_src>
import functools

import jax
import jax.numpy as jnp
import numpy as np
from jax.experimental import pallas as pl
from jax.experimental.pallas import tpu as pltpu

MAX_TILE_B = 128  # batch-tile cap (matches v5e MXU M dim; plenty for megacore)


def _round_up(x, m):
    return (x + m - 1) // m * m


def _fused_tower_kernel(sel_ref, ids_ref, table_ref, w_ref, b_ref, out_ref,
                        emb_ref, sem_ref):
    """One batch tile per grid step.

    sel_ref:   (n_tiles,)          int32 SMEM  -- tower selector (used by index_maps)
    ids_ref:   (n_tiles*tile_b,)   int32 SMEM  -- combined-table row ids
    table_ref: (V, D)              f32   HBM   -- combined embedding table (ANY space)
    w_ref:     (1, D, D_pad)       f32   VMEM  -- selected projection weight (in,out)
    b_ref:     (1, 1, D_pad)       f32   VMEM  -- selected projection bias
    out_ref:   (tile_b, D_pad)     f32   VMEM  -- output tile
    emb_ref:   (tile_b, D)         f32   VMEM scratch -- gathered rows
    sem_ref:   (tile_b,)           DMA semaphores
    """
    del sel_ref  # consumed only by the weight/bias index_maps
    tile_b = emb_ref.shape[0]
    base = pl.program_id(0) * tile_b

    # Issue all row-gather DMAs for this tile; they run concurrently.
    @pl.loop(0, tile_b)
    def _start(r):
        row = ids_ref[base + r]
        pltpu.make_async_copy(
            table_ref.at[pl.ds(row, 1), :],
            emb_ref.at[pl.ds(r, 1), :],
            sem_ref.at[r],
        ).start()

    # Wait for all gathers of this tile.
    @pl.loop(0, tile_b)
    def _wait(r):
        row = ids_ref[base + r]
        pltpu.make_async_copy(
            table_ref.at[pl.ds(row, 1), :],
            emb_ref.at[pl.ds(r, 1), :],
            sem_ref.at[r],
        ).wait()

    # One (tile_b, D) @ (D, D_pad) MXU matmul + bias; lane-dense (128-wide) store.
    out_ref[...] = (
        jnp.dot(emb_ref[...], w_ref[0],
                preferred_element_type=jnp.float32,
                precision=jax.lax.Precision.HIGHEST)
        + b_ref[0]
    ).astype(out_ref.dtype)


@functools.partial(jax.jit, static_argnames=("user_rows", "tile_b"))
def two_tower_forward(user_ids, pos_item_ids, neg_item_ids, table, w, b, *,
                      user_rows, tile_b):
    """Fused forward: returns (user_emb, pos_item_emb, neg_item_emb)."""
    V, D = table.shape
    D_pad = w.shape[-1]
    item_rows = V - user_rows

    B_u = user_ids.shape[0]
    B_p = pos_item_ids.shape[0]
    B_n = neg_item_ids.shape[0]
    B_i = B_p + B_n

    # Clamp ids to valid rows (PyTorch would raise on OOB) and offset item ids
    # into the combined table.
    u_ids = jnp.clip(user_ids.astype(jnp.int32), 0, user_rows - 1)
    i_ids = jnp.clip(
        jnp.concatenate([pos_item_ids, neg_item_ids]).astype(jnp.int32),
        0, item_rows - 1) + user_rows

    u_pad = _round_up(B_u, tile_b)
    i_pad = _round_up(B_i, tile_b)
    u_tiles = u_pad // tile_b
    i_tiles = i_pad // tile_b
    n_tiles = u_tiles + i_tiles

    ids_all = jnp.concatenate([
        jnp.pad(u_ids, (0, u_pad - B_u)),                              # pad with user row 0
        jnp.pad(i_ids, (0, i_pad - B_i), constant_values=user_rows),   # pad with item row 0
    ])
    sel = jnp.concatenate([
        jnp.zeros((u_tiles,), jnp.int32),   # user tower tiles
        jnp.ones((i_tiles,), jnp.int32),    # item tower tiles
    ])

    out = pl.pallas_call(
        _fused_tower_kernel,
        out_shape=jax.ShapeDtypeStruct((n_tiles * tile_b, D_pad), jnp.float32),
        grid_spec=pltpu.PrefetchScalarGridSpec(
            num_scalar_prefetch=2,
            grid=(n_tiles,),
            in_specs=[
                # Combined embedding table: stays in HBM, gathered via manual DMA.
                pl.BlockSpec(memory_space=pl.ANY),
                # Tower-selected projection weight / bias (resident while sel[t] constant).
                pl.BlockSpec((1, D, D_pad), lambda t, sel, ids: (sel[t], 0, 0)),
                pl.BlockSpec((1, 1, D_pad), lambda t, sel, ids: (sel[t], 0, 0)),
            ],
            out_specs=pl.BlockSpec((tile_b, D_pad), lambda t, sel, ids: (t, 0)),
            scratch_shapes=[
                pltpu.VMEM((tile_b, D), jnp.float32),
                pltpu.SemaphoreType.DMA((tile_b,)),
            ],
        ),
        compiler_params=pltpu.CompilerParams(
            dimension_semantics=("parallel",),
        ),
    )(sel, ids_all, table, w, b)

    user_emb = out[:B_u, :D]
    item_out = out[u_pad:u_pad + B_i, :D]
    pos_item_emb = item_out[:B_p]
    neg_item_emb = item_out[B_p:]
    return user_emb, pos_item_emb, neg_item_emb


class TwoTowerPallas:
    """Parameter container + forward mirroring TwoTower (features=None path)."""

    def __init__(self, user_num, item_num, embedding_dim, padding_idx, key,
                 user_feature_dim=None, user_feature_hidden_dim=None,
                 item_feature_dim=None, item_feature_hidden_dim=None):
        if (user_feature_dim is None) != (user_feature_hidden_dim is None):
            raise ValueError("feature_dim and feature_hidden_dim should be provided together")
        if (item_feature_dim is None) != (item_feature_hidden_dim is None):
            raise ValueError("feature_dim and feature_hidden_dim should be provided together")
        # TODO(synk): feature-MLP towers are not implemented; the reference forward
        # raises NotImplementedError whenever features are provided, so nothing is lost.

        ku1, ku2, ku3, ki1, ki2, ki3 = jax.random.split(key, 6)
        D = embedding_dim
        self.D = D
        self.user_rows = user_num + 1

        # Embedding tables: (num + 1, D), padding_idx row zeroed (nn.Embedding behavior).
        user_table = 0.02 * jax.random.normal(ku1, (user_num + 1, D), jnp.float32)
        item_table = 0.02 * jax.random.normal(ki1, (item_num + 1, D), jnp.float32)
        self.user_table = user_table.at[padding_idx].set(0.0)
        self.item_table = item_table.at[padding_idx].set(0.0)
        # Combined (user ++ item) table, built once (HBM-resident in the kernel).
        self.table = jnp.concatenate([self.user_table, self.item_table], axis=0)

        # Projection Linear(D, D): torch layout weight (out, in), bias (out,).
        lim = 1.0 / np.sqrt(D)
        self.user_proj_w = jax.random.uniform(ku2, (D, D), jnp.float32, -lim, lim)
        self.user_proj_b = jax.random.uniform(ku3, (D,), jnp.float32, -lim, lim)
        self.item_proj_w = jax.random.uniform(ki2, (D, D), jnp.float32, -lim, lim)
        self.item_proj_b = jax.random.uniform(ki3, (D,), jnp.float32, -lim, lim)

        # Hoisted kernel-layout params: transposed weight, zero-padded to a
        # lane-dense (128-multiple) output width; bias padded the same way.
        D_pad = _round_up(D, 128)
        self.D_pad = D_pad
        u_wt = jnp.zeros((D, D_pad), jnp.float32).at[:, :D].set(self.user_proj_w.T)
        i_wt = jnp.zeros((D, D_pad), jnp.float32).at[:, :D].set(self.item_proj_w.T)
        u_b = jnp.zeros((D_pad,), jnp.float32).at[:D].set(self.user_proj_b)
        i_b = jnp.zeros((D_pad,), jnp.float32).at[:D].set(self.item_proj_b)
        self.w = jnp.stack([u_wt, i_wt], axis=0)               # (2, D, D_pad)
        self.b = jnp.stack([u_b, i_b], axis=0).reshape(2, 1, D_pad)

    def forward(self, user_ids, pos_item_ids, neg_item_ids,
                user_features=None, pos_item_features=None, neg_item_features=None):
        assert user_ids.ndim == pos_item_ids.ndim == neg_item_ids.ndim == 1
        if (user_features is not None or pos_item_features is not None
                or neg_item_features is not None):
            raise NotImplementedError("feature is not implemented yet")
        B_u = user_ids.shape[0]
        B_i = pos_item_ids.shape[0] + neg_item_ids.shape[0]
        # Big sublane-aligned tiles (<=128): matches MXU M dim; shrinks for tiny batches.
        tile_b = min(MAX_TILE_B, _round_up(max(B_u, B_i), 8))
        return two_tower_forward(
            user_ids, pos_item_ids, neg_item_ids,
            self.table, self.w, self.b,
            user_rows=self.user_rows, tile_b=tile_b)


def _np_tower(ids, table, w, b):
    t = np.asarray(table)
    return t[np.asarray(ids)] @ np.asarray(w).T + np.asarray(b)


if __name__ == "__main__":
    key = jax.random.PRNGKey(0)
    k_model, k_u, k_p, k_n = jax.random.split(key, 4)

    user_num, item_num = 50, 100
    embedding_dim = 32
    padding_idx = 0
    B, N = 4, 2  # batch, negative sample size

    model = TwoTowerPallas(user_num, item_num, embedding_dim, padding_idx, k_model)

    user_ids = jax.random.randint(k_u, (B,), 0, user_num + 1, dtype=jnp.int32)
    pos_item_ids = jax.random.randint(k_p, (B,), 0, item_num + 1, dtype=jnp.int32)
    neg_item_ids = jax.random.randint(k_n, (B * N,), 0, item_num + 1, dtype=jnp.int32)

    user_emb, pos_item_emb, neg_item_emb = model.forward(
        user_ids, pos_item_ids, neg_item_ids)
    jax.block_until_ready((user_emb, pos_item_emb, neg_item_emb))

    # Correctness check against a host-side numpy reference (f32).
    ref_u = _np_tower(user_ids, model.user_table, model.user_proj_w, model.user_proj_b)
    ref_p = _np_tower(pos_item_ids, model.item_table, model.item_proj_w, model.item_proj_b)
    ref_n = _np_tower(neg_item_ids, model.item_table, model.item_proj_w, model.item_proj_b)
    np.testing.assert_allclose(np.asarray(user_emb), ref_u, rtol=1e-5, atol=1e-5)
    np.testing.assert_allclose(np.asarray(pos_item_emb), ref_p, rtol=1e-5, atol=1e-5)
    np.testing.assert_allclose(np.asarray(neg_item_emb), ref_n, rtol=1e-5, atol=1e-5)

    assert user_emb.shape == (B, embedding_dim)
    assert pos_item_emb.shape == (B, embedding_dim)
    assert neg_item_emb.shape == (B * N, embedding_dim)
    print("KERNEL_OK")
</pallas_src>

<mosaic_0001>
module attributes {stable_mosaic.version = 11 : i64} {
  func.func @_fused_tower_kernel(%arg0: i32, %arg1: memref<2xi32, #tpu.memory_space<smem>>, %arg2: memref<32xi32, #tpu.memory_space<smem>>, %arg3: memref<152x32xf32, #tpu.memory_space<any>>, %arg4: memref<1x32x128xf32, #tpu.memory_space<vmem>>, %arg5: memref<1x1x128xf32, #tpu.memory_space<vmem>>, %arg6: memref<16x128xf32, #tpu.memory_space<vmem>>, %arg7: memref<16x32xf32, #tpu.memory_space<vmem>>, %arg8: memref<16x!tpu.dma_semaphore, #tpu.memory_space<semaphore_mem>>) attributes {dimension_semantics = [#tpu.dimension_semantics<parallel>], iteration_bounds = array<i64: 2>, scalar_prefetch = 2 : i64, scratch_operands = 2 : i64, tpu.core_type = #tpu.core_type<tc>, window_params = [{}, {transform_indices = @transform_1, window_bounds = array<i64: 1, 32, 128>}, {transform_indices = @transform_2, window_bounds = array<i64: 1, 1, 128>}, {transform_indices = @transform_3, window_bounds = array<i64: 16, 128>}]} {
    %c16_i32 = arith.constant 16 : i32
    %0 = arith.muli %arg0, %c16_i32 : i32
    %c0_i32 = arith.constant 0 : i32
    %c16_i32_0 = arith.constant 16 : i32
    %1 = arith.addi %c0_i32, %c16_i32_0 : i32
    %c1_i32 = arith.constant 1 : i32
    scf.for %arg9 = %c0_i32 to %1 step %c1_i32  : i32 {
      %c1_i32_15 = arith.constant 1 : i32
      %12 = arith.muli %arg9, %c1_i32_15 : i32
      %c0_i32_16 = arith.constant 0 : i32
      %13 = arith.addi %c0_i32_16, %12 : i32
      %14 = arith.addi %0, %13 : i32
      %15 = arith.index_cast %14 : i32 to index
      %16 = memref.load %arg2[%15] : memref<32xi32, #tpu.memory_space<smem>>
      %c0_i32_17 = arith.constant 0 : i32
      %17 = tpu.memref_slice %arg3[%16, %c0_i32_17] : memref<152x32xf32, #tpu.memory_space<any>> -> memref<1x32xf32, #tpu.memory_space<any>>
      %c0_i32_18 = arith.constant 0 : i32
      %18 = tpu.memref_slice %arg7[%13, %c0_i32_18] : memref<16x32xf32, #tpu.memory_space<vmem>> -> memref<1x32xf32, #tpu.memory_space<vmem>>
      %19 = tpu.memref_slice %arg8[%13] : memref<16x!tpu.dma_semaphore, #tpu.memory_space<semaphore_mem>> -> memref<1x!tpu.dma_semaphore, #tpu.memory_space<semaphore_mem>>
      %20 = tpu.memref_squeeze %19 : memref<1x!tpu.dma_semaphore, #tpu.memory_space<semaphore_mem>> -> memref<!tpu.dma_semaphore, #tpu.memory_space<semaphore_mem>>
      tpu.enqueue_dma source(%17 : memref<1x32xf32, #tpu.memory_space<any>>) target(%18 : memref<1x32xf32, #tpu.memory_space<vmem>>) target_semaphore(%20 : memref<!tpu.dma_semaphore, #tpu.memory_space<semaphore_mem>>)
    }
    %c16_i32_1 = arith.constant 16 : i32
    %c0_i32_2 = arith.constant 0 : i32
    %c16_i32_3 = arith.constant 16 : i32
    %2 = arith.addi %c0_i32_2, %c16_i32_3 : i32
    %c1_i32_4 = arith.constant 1 : i32
    scf.for %arg9 = %c0_i32_2 to %2 step %c1_i32_4  : i32 {
      %c1_i32_15 = arith.constant 1 : i32
      %12 = arith.muli %arg9, %c1_i32_15 : i32
      %c0_i32_16 = arith.constant 0 : i32
      %13 = arith.addi %c0_i32_16, %12 : i32
      %14 = arith.addi %0, %13 : i32
      %15 = arith.index_cast %14 : i32 to index
      %16 = memref.load %arg2[%15] : memref<32xi32, #tpu.memory_space<smem>>
      %c0_i32_17 = arith.constant 0 : i32
      %17 = tpu.memref_slice %arg3[%16, %c0_i32_17] : memref<152x32xf32, #tpu.memory_space<any>> -> memref<1x32xf32, #tpu.memory_space<any>>
      %c0_i32_18 = arith.constant 0 : i32
      %18 = tpu.memref_slice %arg7[%13, %c0_i32_18] : memref<16x32xf32, #tpu.memory_space<vmem>> -> memref<1x32xf32, #tpu.memory_space<vmem>>
      %19 = tpu.memref_slice %arg8[%13] : memref<16x!tpu.dma_semaphore, #tpu.memory_space<semaphore_mem>> -> memref<1x!tpu.dma_semaphore, #tpu.memory_space<semaphore_mem>>
      %20 = tpu.memref_squeeze %19 : memref<1x!tpu.dma_semaphore, #tpu.memory_space<semaphore_mem>> -> memref<!tpu.dma_semaphore, #tpu.memory_space<semaphore_mem>>
      tpu.wait_dma2 semaphore(%20 : memref<!tpu.dma_semaphore, #tpu.memory_space<semaphore_mem>>) src(%17 : memref<1x32xf32, #tpu.memory_space<any>>) dst(%18 : memref<1x32xf32, #tpu.memory_space<vmem>>)
    }
    %c16_i32_5 = arith.constant 16 : i32
    %c0 = arith.constant 0 : index
    %c0_6 = arith.constant 0 : index
    %3 = vector.load %arg7[%c0, %c0_6] : memref<16x32xf32, #tpu.memory_space<vmem>>, vector<16x32xf32>
    %c0_7 = arith.constant 0 : index
    %c0_8 = arith.constant 0 : index
    %c0_9 = arith.constant 0 : index
    %4 = vector.load %arg4[%c0_7, %c0_8, %c0_9] : memref<1x32x128xf32, #tpu.memory_space<vmem>>, vector<1x32x128xf32>
    %5 = vector.shape_cast %4 : vector<1x32x128xf32> to vector<32x128xf32>
    %cst = arith.constant dense<0.000000e+00> : vector<16x128xf32>
    %6 = tpu.matmul %3, %5, %cst {dimension_numbers = #tpu.dot_dimension_numbers<[1], [0], [0], [1], [0, 0, 1, 1], [], []>, precision = #tpu.contract_precision<fp32>} : vector<16x32xf32>, vector<32x128xf32>, vector<16x128xf32> -> vector<16x128xf32>
    %c0_10 = arith.constant 0 : index
    %c0_11 = arith.constant 0 : index
    %c0_12 = arith.constant 0 : index
    %7 = vector.load %arg5[%c0_10, %c0_11, %c0_12] : memref<1x1x128xf32, #tpu.memory_space<vmem>>, vector<1x1x128xf32>
    %8 = vector.shape_cast %7 : vector<1x1x128xf32> to vector<1x128xf32>
    %9 = vector.broadcast %8 : vector<1x128xf32> to vector<16x128xf32>
    %10 = arith.addf %6, %9 : vector<16x128xf32>
    %c0_13 = arith.constant 0 : index
    %c0_14 = arith.constant 0 : index
    %11 = vector.load %arg6[%c0_13, %c0_14] : memref<16x128xf32, #tpu.memory_space<vmem>>, vector<16x128xf32>
    tpu.vector_store %arg6[%c0_13, %c0_14], %10 {strides = array<i32>} : memref<16x128xf32, #tpu.memory_space<vmem>>, vector<16x128xf32>,
    return
  }
  func.func @transform_1(%arg0: i32, %arg1: memref<2xi32, #tpu.memory_space<smem>>, %arg2: memref<32xi32, #tpu.memory_space<smem>>) -> (i32, i32, i32) {
    %0 = arith.index_cast %arg0 : i32 to index
    %1 = memref.load %arg1[%0] : memref<2xi32, #tpu.memory_space<smem>>
    %c0_i32 = arith.constant 0 : i32
    %c0_i32_0 = arith.constant 0 : i32
    %c0_i32_1 = arith.constant 0 : i32
    return %1, %c0_i32, %c0_i32_0 : i32, i32, i32
  }
  func.func @transform_2(%arg0: i32, %arg1: memref<2xi32, #tpu.memory_space<smem>>, %arg2: memref<32xi32, #tpu.memory_space<smem>>) -> (i32, i32, i32) {
    %0 = arith.index_cast %arg0 : i32 to index
    %1 = memref.load %arg1[%0] : memref<2xi32, #tpu.memory_space<smem>>
    %c0_i32 = arith.constant 0 : i32
    %c0_i32_0 = arith.constant 0 : i32
    %c0_i32_1 = arith.constant 0 : i32
    return %1, %c0_i32, %c0_i32_0 : i32, i32, i32
  }
  func.func @transform_3(%arg0: i32, %arg1: memref<2xi32, #tpu.memory_space<smem>>, %arg2: memref<32xi32, #tpu.memory_space<smem>>) -> (i32, i32) {
    %c0_i32 = arith.constant 0 : i32
    %c0_i32_0 = arith.constant 0 : i32
    return %arg0, %c0_i32 : i32, i32
  }
}

</mosaic_0001>

<bundles_post_ra>
// kernel: two_tower_forward.1
= control target key start
LH: loop header
LB: loop body
LE: loop exit
PB: predicated region body
PF: predicated region fallthrough
CT: control target
= control target key end

     0   :  { %s1371_s0 = inlined_call_operand.vmem [shape: s32[2], index: 0, kind: input, shape index: {}]   ;;  %s1372_s2 = inlined_call_operand.vmem [shape: f32[152,32], index: 2, kind: input, shape index: {}]   ;;  %s1373_s3 = inlined_call_operand.vmem [shape: f32[2,32,128], index: 3, kind: input, shape index: {}]   ;;  %s1374_s4 = inlined_call_operand.vmem [shape: f32[2,1,128], index: 4, kind: input, shape index: {}]   ;;  %s1375_s5 = inlined_call_operand.vmem [shape: f32[32,128], index: 5, kind: output, shape index: {}]   ;;  %s1376_s1 = inlined_call_operand.vmem [shape: s32[32], index: 1, kind: input, shape index: {}]  }
   0x1   :  { %s10_s20 = sshll.u32 %s1371_s0, 4  ;;  %s14_s23 = sshll.u32 %s1376_s1, 4  ;;  %s11_s20 = int_to_ptr.vmem [resolvable:$true] %s10_s20  ;;  %s15_s23 = int_to_ptr.vmem [resolvable:$true] %s14_s23 }
   0x2   :  { %s1222_s24 = scalar_lea.vmem %s11_s20, 16  ;;  %p1227_p1 = scmp.lt.s32.totalorder %s11_s20, %s11_s20 }
   0x3   :  { %p1223_p0 = scmp.ne.s32.totalorder %s11_s20, %s1222_s24  ;;  %p1228_p2 = scmp.lt.s32.totalorder %s1222_s24, %s1222_s24 }
   0x5   :  { %p1229_p3 = por %p1228_p2, %p1227_p1 }
   0x7   :  { %p1230_p4 = pnand %p1229_p3, %p1223_p0 }
   0x9   :  { %1233 = shalt.err (!%p1230_p4)  }
   0xa   :  { %s1274_s25 = smov [#allocation5]   ;;  %s1234_s26 = scalar_lea.vmem %s15_s23, 16 }
   0xb   :  { %13 = dma.vmem_to_smem %s11_s20, 16, %s1274_s25, [#allocation4] }
   0xc   :  { %p1235_p5 = scmp.ne.s32.totalorder %s15_s23, %s1234_s26  ;;  %p1239_p6 = scmp.lt.s32.totalorder %s15_s23, %s15_s23 }
   0xd   :  { %p1240_p7 = scmp.lt.s32.totalorder %s1234_s26, %s1234_s26 }
   0xf   :  { %p1241_p8 = por %p1240_p7, %p1239_p6 }
  0x11   :  { %p1242_p9 = pnand %p1241_p8, %p1235_p5 }
  0x13   :  { %1245 = shalt.err (!%p1242_p9)  }
  0x14   :  { %s1275_s0 = smov [#allocation6]  }
  0x15   :  { %17 = dma.vmem_to_smem %s15_s23, 16, %s1275_s0, [#allocation4] }
  0x16   :  { %1258 = dma.done.wait [#allocation4], 32 }
  0x17   :  { %1259 = vsyncadd [#allocation4], 4294967264 }
  0x18   :  { %19 = sfence }
  0x19   :  { %s1312_s1 = smov 0  }
  0x1a LB: > { %s1318_s27 = sadd.s32 4294967295, %s1264_s1   ;;  %p1008_p10 = scmp.ge.s32.totalorder %s1264_s1, 1  ;;  %s1264_s1 = sphi %s1312_s1, %s25_s1  }
  0x1b   : > { %p141_p11 = scmp.lt.s32.totalorder %s1264_s1, 3 }
  0x1d   : > { %p142_p12 = pnand %p1008_p10, %p141_p11 }
  0x1e   : > { %s168_s28 = sld [smem:[#allocation5 + %s1318_s27]] (!%p142_p12)  ;;  %s1011_s30 = sshll.u32 (!%p142_p12), %s1318_s27, 1 }
  0x1f   : > { %145 = sbr.rel (%p142_p12) target bundleno = 314 (0x13a), region = 28  ;;  %s175_s29 = sld [smem:[#allocation5 + %s1318_s27]] (!%p142_p12) }
  0x20   : > { %s1013_s6 = sshll.u32 (!%p142_p12), %s1318_s27, 4  ;;  %p181_p13 = scmp.lt.s32.totalorder (!%p142_p12), %s1011_s30, 3 }
  0x21   : > { %s1266_s18 = smov (!%p142_p12), 0  }
  0x24   : > { %p169_p0 = scmp.lt.s32.totalorder (!%p142_p12), %s168_s28, 1 }
  0x25   : > { %p176_p1 = scmp.lt.s32.totalorder (!%p142_p12), %s175_s29, 1 }
  0x26   : > { %s1378_s30 = smov (!%p181_p13, %s1011_s30), 3  ;;  %s1380_s28 = smov (!%p169_p0, %s168_s28), 1 }
  0x27   : > { %s1012_s7 = sshll.u32 %s1378_s30, 3  ;;  %s1382_s29 = smov (!%p176_p1, %s175_s29), 1 }
  0x28   : > { %s1033_s8 = sshll.u32 %s1380_s28, 5  ;;  %s1331_s11 = scalar_lea.vmem %s1375_s5, %s1012_s7 }
  0x29   : > { %s1336_s14 = scalar_lea.vmem %s1373_s3, %s1033_s8  ;;  %s178_s17 = scalar_lea.vmem %s1374_s4, %s1382_s29 }
  0x2a LB: >> { %s193_s19 = sadd.s32 %s1268_s18, %s1013_s6  ;;  %s196_s24 = scalar_lea.vmem [#allocation2], %s1268_s18  ;;  %s1268_s18 = sphi %s1266_s18, %s192_s18  }
  0x2b   : >> { %s194_s20 = sld [smem:[#allocation6 + %s193_s19]]  ;;  %s197_s25 = scalar_lea.sflag [#allocation3], %s1268_s18 }
  0x31   : >> { %s195_s23 = scalar_lea.vmem %s1372_s2, %s194_s20 }
  0x32   : >> { %v215_v0 = vld [vmem:[%s195_s23] sm:$0x1] }
  0x33   : >> { %216 = vst [vmem:[%s196_s24] sm:$0x1] %v215_v0 }
  0x34   : >> { %241 = vsyncadd %s197_s25, 16  ;;  %s192_s18 = sadd.s32 1, %s1268_s18  }
  0x35   : >> { %p189_p2 = scmp.ge.s32.totalorder %s192_s18, 16  }
  0x36   : > { %s1270_s26 = smov (%p189_p2), 0  }
  0x37   : > { %191 = sbr.rel (!%p189_p2) target bundleno = 42 (0x2a), region = 134 }
  0x3e LB: >> { %s250_s0 = scalar_lea.sflag [#allocation3], %s1272_s26  ;;  %s1272_s26 = sphi %s1270_s26, %s247_s26  }
  0x3f   : >> { %1260 = dma.done.wait %s250_s0, 16 }
  0x40   : >> { %1261 = vsyncadd %s250_s0, 4294967280  ;;  %s247_s26 = sadd.s32 1, %s1272_s26  }
  0x41   : >> { %p244_p3 = scmp.ge.s32.totalorder %s247_s26, 16  }
  0x42   : > { %v256_v1 = vld [vmem:[%s1336_s14] sm:$0xff] (%p244_p3)  ;;  %v257_v2 = vld [vmem:[%s1336_s14 + $0x8] sm:$0xff] (%p244_p3)  ;;  %v258_v3 = vld [vmem:[%s1336_s14 + $0x10] sm:$0xff] (%p244_p3)  ;;  %vm267_vm0 = vcmask (%p244_p3), 261120  }
  0x43   : > { %246 = sbr.rel (!%p244_p3) target bundleno = 62 (0x3e), region = 145  ;;  %v275_v4 = vand.u32 (%p244_p3), 4294901760, %v256_v1  ;;  %v278_v5 = vand.u32 (%p244_p3), 4294901760, %v257_v2  ;;  %v259_v6 = vld [vmem:[%s1336_s14 + $0x18] sm:$0xff] (%p244_p3)  ;;  %v281_v7 = vand.u32 (%p244_p3), 4294901760, %v258_v3  ;;  %v254_v8 = vld [vmem:[#allocation2] sm:$0xff] (%p244_p3) }
  0x44   : > { %v255_v9 = vld [vmem:[#allocation2 + $0x8] sm:$0xff] (%p244_p3)  ;;  %v284_v10 = vand.u32 (%p244_p3), 4294901760, %v259_v6  ;;  %v269_v11 = vsel (%p244_p3), %vm267_vm0, %v254_v8, 0  ;;  %v1014_v47 = vld [vmem:[%s178_s17] ss:$0 sm:$0xff] (%p244_p3) }
  0x45   : > { %v272_v12 = vsel (%p244_p3), %vm267_vm0, %v255_v9, 0  ;;  %v1136_v13 = vpack.c.bf16 (%p244_p3), %v278_v5, %v275_v4  ;;  %v1349_v14 = vand.u32 (%p244_p3), 4294901760, %v269_v11  ;;  %v365_v16 = vsub.f32 (%p244_p3), %v256_v1, %v275_v4 }
  0x46   : > { %v1351_v15 = vand.u32 (%p244_p3), 4294901760, %v272_v12  ;;  %v1140_v17 = vpack.c.bf16 (%p244_p3), %v284_v10, %v281_v7  ;;  %v372_v18 = vsub.f32 (%p244_p3), %v257_v2, %v278_v5  ;;  %v379_v19 = vsub.f32 (%p244_p3), %v258_v3, %v281_v7 }
  0x47   : > { %v386_v20 = vsub.f32 (%p244_p3), %v259_v6, %v284_v10  ;;  %1137 = vmatprep.subr.bf16.mxu1 (%p244_p3), %v1136_v13  ;;  %1161 = vmatprep.subr.bf16.mxu0 (%p244_p3), %v1136_v13  ;;  %v344_v21 = vsub.f32 (%p244_p3), %v269_v11, %v1349_v14  ;;  %v366_v23 = vand.u32 (%p244_p3), 4294901760, %v365_v16 }
  0x48   : > { %v354_v22 = vsub.f32 (%p244_p3), %v272_v12, %v1351_v15  ;;  %1139 = vmatpush3.bf16.msra.mxu1 (%p244_p3), %v1136_v13  ;;  %1163 = vmatpush3.bf16.msra.mxu0 (%p244_p3), %v1136_v13  ;;  %v373_v24 = vand.u32 (%p244_p3), 4294901760, %v372_v18  ;;  %v380_v25 = vand.u32 (%p244_p3), 4294901760, %v379_v19  ;;  %v1152_v45 = vpack.c.bf16 (%p244_p3), %v372_v18, %v365_v16 }
  0x49   : > { %v387_v26 = vand.u32 (%p244_p3), 4294901760, %v386_v20  ;;  %1141 = vmatprep.subr.bf16.mxu1 (%p244_p3), %v1140_v17  ;;  %1165 = vmatprep.subr.bf16.mxu0 (%p244_p3), %v1140_v17  ;;  %v345_v27 = vand.u32 (%p244_p3), 4294901760, %v344_v21  ;;  %v367_v29 = vsub.f32 (%p244_p3), %v365_v16, %v366_v23  ;;  %v1156_v46 = vpack.c.bf16 (%p244_p3), %v386_v20, %v379_v19 }
  0x4a   : > { %v355_v28 = vand.u32 4294901760, %v354_v22  ;;  %v374_v30 = vsub.f32 %v372_v18, %v373_v24  ;;  %v1168_v31 = vpack.c.bf16 %v373_v24, %v366_v23  ;;  %v381_v32 = vsub.f32 %v379_v19, %v380_v25 }
  0x4b   : > { %v388_v33 = vsub.f32 %v386_v20, %v387_v26  ;;  %v346_v34 = vsub.f32 %v344_v21, %v345_v27  ;;  %1111 = vmatprep.mubr.f32.mxu0 %v345_v27  ;;  %v368_v36 = vand.u32 4294901760, %v367_v29  ;;  %v1172_v44 = vpack.c.bf16 %v387_v26, %v380_v25 }
  0x4c   : > { %v356_v35 = vsub.f32 %v354_v22, %v355_v28  ;;  %1143 = vmatpush3.bf16.msra.mxu1 %v1140_v17  ;;  %1167 = vmatpush3.bf16.msra.mxu0 %v1140_v17  ;;  %v375_v37 = vand.u32 4294901760, %v374_v30  ;;  %v382_v38 = vand.u32 4294901760, %v381_v32 }
  0x4d   : > { %v389_v39 = vand.u32 4294901760, %v388_v33  ;;  %v347_v40 = vand.u32 4294901760, %v346_v34  ;;  %1169 = vmatprep.subr.bf16.mxu0 %v1168_v31 }
  0x4e   : > { %v357_v41 = vand.u32 4294901760, %v356_v35  ;;  %v1144_v42 = vpack.c.bf16 %v375_v37, %v368_v36 }
  0x4f   : > { %v1148_v43 = vpack.c.bf16 %v389_v39, %v382_v38  ;;  %1078 = vmatprep.mubr.f32.mxu1 %v347_v40  ;;  %1112 = vmatmul.mubr.f32.vlgmr.msra.gmra.mrb[0].mxu0 %v355_v28 }
  0x50   : > { %1079 = vmatmul.mubr.f32.vlgmr.msra.gmra.mrb[0].mxu1 %v357_v41  ;;  %1145 = vmatprep.subr.bf16.mxu1 %v1144_v42 }
  0x51   : > { %1147 = vmatpush3.bf16.msra.mxu1 %v1144_v42  ;;  %1171 = vmatpush3.bf16.msra.mxu0 %v1168_v31 }
  0x52   : > { %1149 = vmatprep.subr.bf16.mxu1 %v1148_v43  ;;  %1173 = vmatprep.subr.bf16.mxu0 %v1172_v44 }
  0x53   : > { %1089 = vmatprep.mubr.f32.mxu1 %v1349_v14  ;;  %1122 = vmatprep.mubr.f32.mxu0 %v1349_v14 }
  0x55   : > { %1151 = vmatpush3.bf16.msra.mxu1 %v1148_v43  ;;  %1175 = vmatpush3.bf16.msra.mxu0 %v1172_v44 }
  0x56   : > { %1153 = vmatprep.subr.bf16.mxu1 %v1152_v45  ;;  %1177 = vmatprep.subr.bf16.mxu0 %v1136_v13 }
  0x58   : > { %1090 = vmatmul.mubr.f32.vlgmr.msra.gmra.mrb[0].mxu1 %v1351_v15  ;;  %1123 = vmatmul.mubr.f32.vlgmr.msra.gmra.mrb[0].mxu0 %v1351_v15 }
  0x59   : > { %1155 = vmatpush3.bf16.msra.mxu1 %v1152_v45  ;;  %1179 = vmatpush3.bf16.msra.mxu0 %v1136_v13 }
  0x5a   : > { %1157 = vmatprep.subr.bf16.mxu1 %v1156_v46  ;;  %1181 = vmatprep.subr.bf16.mxu0 %v1140_v17 }
  0x5b   : > { %1100 = vmatprep.mubr.f32.mxu1 %v344_v21  ;;  %1133 = vmatprep.mubr.f32.mxu0 %v1349_v14 }
  0x5d   : > { %1159 = vmatpush3.bf16.msra.mxu1 %v1156_v46  ;;  %1183 = vmatpush3.bf16.msra.mxu0 %v1140_v17 }
  0x60   : > { %1101 = vmatmul.mubr.f32.vlgmr.msra.gmra.mrb[0].mxu1 %v354_v22  ;;  %1134 = vmatmul.mubr.f32.vlgmr.msra.gmra.mrb[0].mxu0 %v1351_v15 }
 0x133   : > { %v1102_v48 = vpop.f32.mrb[0].mxu1  ;;  %v1135_v49 = vpop.f32.mrb[0].mxu0 }
 0x134   : > { %v1184_v50 = vadd.f32 %v1102_v48, %v1014_v47  ;;  %v536_v51 = vpop.f32.mrb[1].mxu1  ;;  %v792_v52 = vpop.f32.mrb[1].mxu0 }
 0x135   : > { %v1186_v53 = vadd.f32 %v1014_v47, %v536_v51 }
 0x136   : > { %v1185_v54 = vadd.f32 %v1184_v50, %v1135_v49 }
 0x137   : > { %v1187_v55 = vadd.f32 %v1186_v53, %v792_v52 }
 0x138   : > { %803 = vst [vmem:[%s1331_s11 + $0x8] sm:$0xff] %v1185_v54 }
 0x139   : > { %802 = vst [vmem:[%s1331_s11] sm:$0xff] %v1187_v55 }
 0x13a PF: > { %s25_s1 = sadd.s32 1, %s1264_s1  }
 0x13b   : > { %p22_p4 = scmp.ge.s32.totalorder %s25_s1, 4  }
 0x13d   :  { %24 = sbr.rel (!%p22_p4) target bundleno = 26 (0x1a), region = 156 }
 0x144   :  { %826 = vsyncmov [#allocation3] }
 0x147   :  { %s827_s29 = vpop.sfrf %826 }
 0x148   :  { %p1017_p5 = scmp.ne.s32.totalorder %s827_s29, 0 }
 0x14a   :  { %831 = shalt.err (%p1017_p5)  }
 0x14b   :  { %833 = vsyncmov [#allocation3 + $0x1] }
 0x14e   :  { %s834_s30 = vpop.sfrf %833 }
 0x14f   :  { %p1018_p6 = scmp.ne.s32.totalorder %s834_s30, 0 }
 0x151   :  { %838 = shalt.err (%p1018_p6)  }
 0x152   :  { %840 = vsyncmov [#allocation3 + $0x2] }
 0x155   :  { %s841_s6 = vpop.sfrf %840 }
 0x156   :  { %p1019_p7 = scmp.ne.s32.totalorder %s841_s6, 0 }
 0x158   :  { %845 = shalt.err (%p1019_p7)  }
 0x159   :  { %847 = vsyncmov [#allocation3 + $0x3] }
 0x15c   :  { %s848_s7 = vpop.sfrf %847 }
 0x15d   :  { %p1020_p8 = scmp.ne.s32.totalorder %s848_s7, 0 }
 0x15f   :  { %852 = shalt.err (%p1020_p8)  }
 0x160   :  { %854 = vsyncmov [#allocation3 + $0x4] }
 0x163   :  { %s855_s8 = vpop.sfrf %854 }
 0x164   :  { %p1021_p9 = scmp.ne.s32.totalorder %s855_s8, 0 }
 0x166   :  { %859 = shalt.err (%p1021_p9)  }
 0x167   :  { %861 = vsyncmov [#allocation3 + $0x5] }
 0x16a   :  { %s862_s2 = vpop.sfrf %861 }
 0x16b   :  { %p1022_p10 = scmp.ne.s32.totalorder %s862_s2, 0 }
 0x16d   :  { %866 = shalt.err (%p1022_p10)  }
 0x16e   :  { %868 = vsyncmov [#allocation3 + $0x6] }
 0x171   :  { %s869_s3 = vpop.sfrf %868 }
 0x172   :  { %p1023_p11 = scmp.ne.s32.totalorder %s869_s3, 0 }
 0x174   :  { %873 = shalt.err (%p1023_p11)  }
 0x175   :  { %875 = vsyncmov [#allocation3 + $0x7] }
 0x178   :  { %s876_s4 = vpop.sfrf %875 }
 0x179   :  { %p1024_p12 = scmp.ne.s32.totalorder %s876_s4, 0 }
 0x17b   :  { %880 = shalt.err (%p1024_p12)  }
 0x17c   :  { %882 = vsyncmov [#allocation3 + $0x8] }
 0x17f   :  { %s883_s5 = vpop.sfrf %882 }
 0x180   :  { %p1025_p13 = scmp.ne.s32.totalorder %s883_s5, 0 }
 0x182   :  { %887 = shalt.err (%p1025_p13)  }
 0x183   :  { %889 = vsyncmov [#allocation3 + $0x9] }
 0x186   :  { %s890_s1 = vpop.sfrf %889 }
 0x187   :  { %p1026_p0 = scmp.ne.s32.totalorder %s890_s1, 0 }
 0x189   :  { %894 = shalt.err (%p1026_p0)  }
 0x18a   :  { %896 = vsyncmov [#allocation3 + $0xa] }
 0x18d   :  { %s897_s9 = vpop.sfrf %896 }
 0x18e   :  { %p1027_p1 = scmp.ne.s32.totalorder %s897_s9, 0 }
 0x190   :  { %901 = shalt.err (%p1027_p1)  }
 0x191   :  { %903 = vsyncmov [#allocation3 + $0xb] }
 0x194   :  { %s904_s10 = vpop.sfrf %903 }
 0x195   :  { %p1028_p2 = scmp.ne.s32.totalorder %s904_s10, 0 }
 0x197   :  { %908 = shalt.err (%p1028_p2)  }
 0x198   :  { %910 = vsyncmov [#allocation3 + $0xc] }
 0x19b   :  { %s911_s11 = vpop.sfrf %910 }
 0x19c   :  { %p1029_p3 = scmp.ne.s32.totalorder %s911_s11, 0 }
 0x19e   :  { %915 = shalt.err (%p1029_p3)  }
 0x19f   :  { %917 = vsyncmov [#allocation3 + $0xd] }
 0x1a2   :  { %s918_s12 = vpop.sfrf %917 }
 0x1a3   :  { %p1030_p4 = scmp.ne.s32.totalorder %s918_s12, 0 }
 0x1a5   :  { %922 = shalt.err (%p1030_p4)  }
 0x1a6   :  { %924 = vsyncmov [#allocation3 + $0xe] }
 0x1a9   :  { %s925_s13 = vpop.sfrf %924 }
 0x1aa   :  { %p1031_p5 = scmp.ne.s32.totalorder %s925_s13, 0 }
 0x1ac   :  { %929 = shalt.err (%p1031_p5)  }
 0x1ad   :  { %931 = vsyncmov [#allocation3 + $0xf] }
 0x1b0   :  { %s932_s14 = vpop.sfrf %931 }
 0x1b1   :  { %p1032_p6 = scmp.ne.s32.totalorder %s932_s14, 0 }
 0x1b3   :  { %936 = shalt.err (%p1032_p6)  }

</bundles_post_ra>
